<compile_context>
chip_gen: v7x
topology: tpu7x:2x2x1
jax: 0.10.0
libtpu: 0.0.40
codegen_flags: <defaults>
</compile_context>

<pallas_src>
import functools

import jax
import jax.numpy as jnp
from jax.experimental import pallas as pl
from jax.experimental.pallas import tpu as pltpu


def _round_up(x, m):
    return (x + m - 1) // m * m


def _edge_decoder_kernel(idx_c_ref, idx_d_ref, a_cell_ref, a_drug_ref,
                         b1_ref, w2_ref, b2_ref, o_ref):
    n_cell = a_cell_ref.shape[1]
    n_drug = a_drug_ref.shape[1]
    tile_e = o_ref.shape[-1]

    idx_c = idx_c_ref[0]                      # (1, tile_e) int32, edges on lanes
    idx_d = idx_d_ref[0]                      # (1, tile_e) int32

    # In-kernel gather expressed as one-hot masks (exact 0/1) -> MXU matmul.
    oh_c = (jax.lax.broadcasted_iota(jnp.int32, (n_cell, tile_e), 0)
            == idx_c).astype(jnp.float32)     # (n_cell, tile_e)
    oh_d = (jax.lax.broadcasted_iota(jnp.int32, (n_drug, tile_e), 0)
            == idx_d).astype(jnp.float32)     # (n_drug, tile_e)

    # lin1 over the concatenated features (concat folded into the projected
    # tables), transposed layout:  h^T = A_cell[:, row1] + A_drug[:, row2] + b1
    h = (jnp.dot(a_cell_ref[...], oh_c, preferred_element_type=jnp.float32)
         + jnp.dot(a_drug_ref[...], oh_d, preferred_element_type=jnp.float32)
         + b1_ref[...])                       # (H, tile_e)
    h = jax.nn.sigmoid(h)

    # lin2 (out_features = 1): VPU multiply + sublane reduce -> lane-dense row.
    logit = jnp.sum(h * w2_ref[...], axis=0, keepdims=True) + b2_ref[0]
    o_ref[0] = jax.nn.sigmoid(logit).astype(o_ref.dtype)     # (1, tile_e)


@functools.partial(jax.jit, static_argnames=("tile_e",))
def edge_decoder_pallas(z_cell, z_drug, edge_label_index,
                        w1, b1, w2, b2, *, tile_e=512):
    """Pallas implementation of EdgeDecoder.forward.

    Args:
      z_cell: (N_cell, H) float32 node embeddings for 'cellline'.
      z_drug: (N_drug, H) float32 node embeddings for 'drug'.
      edge_label_index: (2, E) int [row1; row2].
      w1: (H, 2H)  lin1 weight in PyTorch (out, in) layout.
      b1: (H,)     lin1 bias.
      w2: (1, H)   lin2 weight in PyTorch (out, in) layout.
      b2: (1,)     lin2 bias.

    Returns:
      (E,) float32 predictions.
    """
    H = z_cell.shape[-1]
    n_cell, n_drug = z_cell.shape[0], z_drug.shape[0]
    E = edge_label_index.shape[1]

    # Lane-dense edge tiles; clamp for small E, keep a multiple of 128 lanes.
    tile_e = max(128, min(int(tile_e), _round_up(E, 128)))
    e_pad = _round_up(E, tile_e)
    grid_e = e_pad // tile_e
    pad = e_pad - E

    row1 = edge_label_index[0].astype(jnp.int32)
    row2 = edge_label_index[1].astype(jnp.int32)
    # Pad with index 0 (always a valid row); padded outputs are sliced off.
    row1 = jnp.pad(row1, (0, pad)).reshape(grid_e, 1, tile_e)
    row2 = jnp.pad(row2, (0, pad)).reshape(grid_e, 1, tile_e)

    # Fold gather + concat + lin1 weight into two tiny projected tables:
    #   cat([z_cell[r1], z_drug[r2]]) @ W1.T
    #     == (W1[:, :H] @ z_cell.T)[:, r1] + (W1[:, H:] @ z_drug.T)[:, r2]
    hi = jax.lax.Precision.HIGHEST
    a_cell = jnp.dot(w1[:, :H], z_cell.T, precision=hi).astype(jnp.float32)
    a_drug = jnp.dot(w1[:, H:], z_drug.T, precision=hi).astype(jnp.float32)
    b1_col = b1.reshape(H, 1).astype(jnp.float32)
    w2_col = w2.reshape(H, 1).astype(jnp.float32)
    b2_s = b2.reshape(1).astype(jnp.float32)

    cost = pl.CostEstimate(
        flops=2 * e_pad * H * (n_cell + n_drug) + 4 * e_pad * H,
        transcendentals=e_pad * (H + 1),
        bytes_accessed=(e_pad * (2 * 4 + 4)          # indices in, scalars out
                        + (n_cell + n_drug) * H * 4  # resident tables
                        + 2 * H * 4),
    )

    out = pl.pallas_call(
        _edge_decoder_kernel,
        out_shape=jax.ShapeDtypeStruct((grid_e, 1, tile_e), jnp.float32),
        grid_spec=pltpu.PrefetchScalarGridSpec(
            num_scalar_prefetch=0,
            grid=(grid_e,),
            in_specs=[
                pl.BlockSpec((1, 1, tile_e), lambda i: (i, 0, 0)),   # row1 tile
                pl.BlockSpec((1, 1, tile_e), lambda i: (i, 0, 0)),   # row2 tile
                pl.BlockSpec((H, n_cell), lambda i: (0, 0)),         # A_cell
                pl.BlockSpec((H, n_drug), lambda i: (0, 0)),         # A_drug
                pl.BlockSpec((H, 1), lambda i: (0, 0)),              # b1 column
                pl.BlockSpec((H, 1), lambda i: (0, 0)),              # w2 column
                pl.BlockSpec(memory_space=pltpu.MemorySpace.SMEM),   # b2 scalar
            ],
            out_specs=pl.BlockSpec((1, 1, tile_e), lambda i: (i, 0, 0)),
        ),
        compiler_params=pltpu.CompilerParams(
            dimension_semantics=("parallel",)),
        cost_estimate=cost,
    )(row1, row2, a_cell, a_drug, b1_col, w2_col, b2_s)

    return out.reshape(-1)[:E]                # == z.view(-1)


def _reference(z_cell, z_drug, edge_label_index, w1, b1, w2, b2):
    """Pure-JAX reference mirroring the PyTorch forward (high precision)."""
    hi = jax.lax.Precision.HIGHEST
    row1, row2 = edge_label_index[0], edge_label_index[1]
    z = jnp.concatenate([z_cell[row1], z_drug[row2]], axis=-1)
    z = jax.nn.sigmoid(jnp.dot(z, w1.T, precision=hi) + b1)
    z = jax.nn.sigmoid(jnp.dot(z, w2.T, precision=hi) + b2)
    return z.reshape(-1)


if __name__ == "__main__":
    hidden_channels = 32
    n_cell, n_drug = 16, 20
    n_edges = 1000            # not a multiple of the tile -> exercises padding

    key = jax.random.PRNGKey(0)
    k1, k2, k3, k4, k5, k6, k7, k8 = jax.random.split(key, 8)

    # Node embeddings (outputs of the upstream GNN encoder).
    z_cell = jax.random.normal(k1, (n_cell, hidden_channels), jnp.float32)
    z_drug = jax.random.normal(k2, (n_drug, hidden_channels), jnp.float32)

    # Edge label index (2, E): [cellline indices; drug indices].
    row1 = jax.random.randint(k3, (n_edges,), 0, n_cell, jnp.int32)
    row2 = jax.random.randint(k4, (n_edges,), 0, n_drug, jnp.int32)
    edge_label_index = jnp.stack([row1, row2], axis=0)

    # Deterministic parameter init (PyTorch Linear: U(-1/sqrt(in), 1/sqrt(in))).
    in1 = 2 * hidden_channels
    lim1 = 1.0 / jnp.sqrt(jnp.float32(in1))
    w1 = jax.random.uniform(k5, (hidden_channels, in1), jnp.float32, -lim1, lim1)
    b1 = jax.random.uniform(k6, (hidden_channels,), jnp.float32, -lim1, lim1)
    in2 = hidden_channels
    lim2 = 1.0 / jnp.sqrt(jnp.float32(in2))
    w2 = jax.random.uniform(k7, (1, in2), jnp.float32, -lim2, lim2)
    b2 = jax.random.uniform(k8, (1,), jnp.float32, -lim2, lim2)

    out = edge_decoder_pallas(z_cell, z_drug, edge_label_index, w1, b1, w2, b2)
    out = jax.block_until_ready(out)

    ref = _reference(z_cell, z_drug, edge_label_index, w1, b1, w2, b2)
    assert out.shape == (n_edges,)
    # Tolerance accounts for the TPU matmul precision path of the in-kernel
    # f32 dots (MXU may round operands toward bf16); outputs are post-sigmoid,
    # so wiring errors would show up as O(0.1) deviations, far above this.
    assert jnp.allclose(out, ref, atol=2e-3, rtol=2e-3), "mismatch vs reference"

    print("KERNEL_OK")
</pallas_src>

<mosaic_0001>
module attributes {stable_mosaic.version = 11 : i64} {
  func.func @_edge_decoder_kernel(%arg0: i32, %arg1: memref<1x1x512xi32, #tpu.memory_space<vmem>>, %arg2: memref<1x1x512xi32, #tpu.memory_space<vmem>>, %arg3: memref<32x16xf32, #tpu.memory_space<vmem>>, %arg4: memref<32x20xf32, #tpu.memory_space<vmem>>, %arg5: memref<32x1xf32, #tpu.memory_space<vmem>>, %arg6: memref<32x1xf32, #tpu.memory_space<vmem>>, %arg7: memref<1xf32, #tpu.memory_space<smem>>, %arg8: memref<1x1x512xf32, #tpu.memory_space<vmem>>) attributes {dimension_semantics = [#tpu.dimension_semantics<parallel>], iteration_bounds = array<i64: 2>, scalar_prefetch = 0 : i64, scratch_operands = 0 : i64, tpu.core_type = #tpu.core_type<tc>, window_params = [{transform_indices = @transform_0, window_bounds = array<i64: 1, 1, 512>}, {transform_indices = @transform_1, window_bounds = array<i64: 1, 1, 512>}, {pipeline_mode = #tpu.pipeline_mode<synchronous>, transform_indices = @transform_2, window_bounds = array<i64: 32, 16>}, {pipeline_mode = #tpu.pipeline_mode<synchronous>, transform_indices = @transform_3, window_bounds = array<i64: 32, 20>}, {pipeline_mode = #tpu.pipeline_mode<synchronous>, transform_indices = @transform_4, window_bounds = array<i64: 32, 1>}, {pipeline_mode = #tpu.pipeline_mode<synchronous>, transform_indices = @transform_5, window_bounds = array<i64: 32, 1>}, {transform_indices = @transform_6, window_bounds = array<i64: 1>}, {transform_indices = @transform_7, window_bounds = array<i64: 1, 1, 512>}]} {
    %c0 = arith.constant 0 : index
    %c0_0 = arith.constant 0 : index
    %c0_1 = arith.constant 0 : index
    %0 = vector.load %arg1[%c0, %c0_0, %c0_1] : memref<1x1x512xi32, #tpu.memory_space<vmem>>, vector<1x1x512xi32>
    %1 = vector.shape_cast %0 : vector<1x1x512xi32> to vector<1x512xi32>
    %c0_2 = arith.constant 0 : index
    %c0_3 = arith.constant 0 : index
    %c0_4 = arith.constant 0 : index
    %2 = vector.load %arg2[%c0_2, %c0_3, %c0_4] : memref<1x1x512xi32, #tpu.memory_space<vmem>>, vector<1x1x512xi32>
    %3 = vector.shape_cast %2 : vector<1x1x512xi32> to vector<1x512xi32>
    %4 = tpu.iota {dimensions = array<i32: 0>} : vector<16x512xi32>
    %5 = vector.broadcast %1 : vector<1x512xi32> to vector<16x512xi32>
    %6 = arith.cmpi eq, %4, %5 : vector<16x512xi32>
    %7 = arith.extui %6 : vector<16x512xi1> to vector<16x512xi32>
    %8 = arith.sitofp %7 : vector<16x512xi32> to vector<16x512xf32>
    %9 = tpu.iota {dimensions = array<i32: 0>} : vector<20x512xi32>
    %10 = vector.broadcast %3 : vector<1x512xi32> to vector<20x512xi32>
    %11 = arith.cmpi eq, %9, %10 : vector<20x512xi32>
    %12 = arith.extui %11 : vector<20x512xi1> to vector<20x512xi32>
    %13 = arith.sitofp %12 : vector<20x512xi32> to vector<20x512xf32>
    %c0_5 = arith.constant 0 : index
    %c0_6 = arith.constant 0 : index
    %14 = vector.load %arg3[%c0_5, %c0_6] : memref<32x16xf32, #tpu.memory_space<vmem>>, vector<32x16xf32>
    %cst = arith.constant dense<0.000000e+00> : vector<32x512xf32>
    %15 = tpu.matmul %14, %8, %cst {dimension_numbers = #tpu.dot_dimension_numbers<[1], [0], [0], [1], [0, 0, 1, 1], [], []>} : vector<32x16xf32>, vector<16x512xf32>, vector<32x512xf32> -> vector<32x512xf32>
    %c0_7 = arith.constant 0 : index
    %c0_8 = arith.constant 0 : index
    %16 = vector.load %arg4[%c0_7, %c0_8] : memref<32x20xf32, #tpu.memory_space<vmem>>, vector<32x20xf32>
    %cst_9 = arith.constant dense<0.000000e+00> : vector<32x512xf32>
    %17 = tpu.matmul %16, %13, %cst_9 {dimension_numbers = #tpu.dot_dimension_numbers<[1], [0], [0], [1], [0, 0, 1, 1], [], []>} : vector<32x20xf32>, vector<20x512xf32>, vector<32x512xf32> -> vector<32x512xf32>
    %18 = arith.addf %15, %17 : vector<32x512xf32>
    %c0_10 = arith.constant 0 : index
    %c0_11 = arith.constant 0 : index
    %19 = vector.load %arg5[%c0_10, %c0_11] : memref<32x1xf32, #tpu.memory_space<vmem>>, vector<32x1xf32>
    %20 = vector.broadcast %19 : vector<32x1xf32> to vector<32x512xf32>
    %21 = arith.addf %18, %20 : vector<32x512xf32>
    %22 = arith.negf %21 : vector<32x512xf32>
    %23 = math.exp %22 : vector<32x512xf32>
    %cst_12 = arith.constant 1.000000e+00 : f32
    %24 = vector.broadcast %cst_12 : f32 to vector<32x512xf32>
    %25 = arith.addf %24, %23 : vector<32x512xf32>
    %26 = arith.divf %24, %25 : vector<32x512xf32>
    %c0_13 = arith.constant 0 : index
    %c0_14 = arith.constant 0 : index
    %27 = vector.load %arg6[%c0_13, %c0_14] : memref<32x1xf32, #tpu.memory_space<vmem>>, vector<32x1xf32>
    %28 = vector.broadcast %27 : vector<32x1xf32> to vector<32x512xf32>
    %29 = arith.mulf %26, %28 : vector<32x512xf32>
    %cst_15 = arith.constant dense<0.000000e+00> : vector<512xf32>
    %30 = vector.multi_reduction <add>, %29, %cst_15 [0] : vector<32x512xf32> to vector<512xf32>
    %31 = vector.shape_cast %30 : vector<512xf32> to vector<1x512xf32>
    %c0_16 = arith.constant 0 : index
    %32 = memref.load %arg7[%c0_16] : memref<1xf32, #tpu.memory_space<smem>>
    %33 = vector.broadcast %32 : f32 to vector<1x512xf32>
    %34 = arith.addf %31, %33 : vector<1x512xf32>
    %35 = arith.negf %34 : vector<1x512xf32>
    %36 = math.exp %35 : vector<1x512xf32>
    %cst_17 = arith.constant 1.000000e+00 : f32
    %37 = vector.broadcast %cst_17 : f32 to vector<1x512xf32>
    %38 = arith.addf %37, %36 : vector<1x512xf32>
    %39 = arith.divf %37, %38 : vector<1x512xf32>
    %c0_18 = arith.constant 0 : index
    %c0_19 = arith.constant 0 : index
    %c0_20 = arith.constant 0 : index
    %40 = vector.load %arg8[%c0_18, %c0_19, %c0_20] : memref<1x1x512xf32, #tpu.memory_space<vmem>>, vector<1x1x512xf32>
    %41 = vector.shape_cast %40 : vector<1x1x512xf32> to vector<1x512xf32>
    %42 = vector.shape_cast %39 : vector<1x512xf32> to vector<1x1x512xf32>
    tpu.vector_store %arg8[%c0_18, %c0_19, %c0_20], %42 {strides = array<i32>} : memref<1x1x512xf32, #tpu.memory_space<vmem>>, vector<1x1x512xf32>,
    return
  }
  func.func @transform_0(%arg0: i32) -> (i32, i32, i32) {
    %c0_i32 = arith.constant 0 : i32
    %c0_i32_0 = arith.constant 0 : i32
    %c0_i32_1 = arith.constant 0 : i32
    return %arg0, %c0_i32, %c0_i32_0 : i32, i32, i32
  }
  func.func @transform_1(%arg0: i32) -> (i32, i32, i32) {
    %c0_i32 = arith.constant 0 : i32
    %c0_i32_0 = arith.constant 0 : i32
    %c0_i32_1 = arith.constant 0 : i32
    return %arg0, %c0_i32, %c0_i32_0 : i32, i32, i32
  }
  func.func @transform_2(%arg0: i32) -> (i32, i32) {
    %c0_i32 = arith.constant 0 : i32
    %c0_i32_0 = arith.constant 0 : i32
    %c0_i32_1 = arith.constant 0 : i32
    return %c0_i32, %c0_i32_0 : i32, i32
  }
  func.func @transform_3(%arg0: i32) -> (i32, i32) {
    %c0_i32 = arith.constant 0 : i32
    %c0_i32_0 = arith.constant 0 : i32
    %c0_i32_1 = arith.constant 0 : i32
    return %c0_i32, %c0_i32_0 : i32, i32
  }
  func.func @transform_4(%arg0: i32) -> (i32, i32) {
    %c0_i32 = arith.constant 0 : i32
    %c0_i32_0 = arith.constant 0 : i32
    %c0_i32_1 = arith.constant 0 : i32
    return %c0_i32, %c0_i32_0 : i32, i32
  }
  func.func @transform_5(%arg0: i32) -> (i32, i32) {
    %c0_i32 = arith.constant 0 : i32
    %c0_i32_0 = arith.constant 0 : i32
    %c0_i32_1 = arith.constant 0 : i32
    return %c0_i32, %c0_i32_0 : i32, i32
  }
  func.func @transform_6(%arg0: i32) -> i32 {
    %c0_i32 = arith.constant 0 : i32
    %c0_i32_0 = arith.constant 0 : i32
    return %c0_i32 : i32
  }
  func.func @transform_7(%arg0: i32) -> (i32, i32, i32) {
    %c0_i32 = arith.constant 0 : i32
    %c0_i32_0 = arith.constant 0 : i32
    %c0_i32_1 = arith.constant 0 : i32
    return %arg0, %c0_i32, %c0_i32_0 : i32, i32, i32
  }
}

</mosaic_0001>

<bundles_post_ra>
// kernel: edge_decoder_pallas.1
= control target key start
LH: loop header
LB: loop body
LE: loop exit
PB: predicated region body
PF: predicated region fallthrough
CT: control target
= control target key end

     0   :  { %s1743_s0 = inlined_call_operand.vmem [shape: s32[2,1,512], index: 0, kind: input, shape index: {}]   ;;  %s1744_s1 = inlined_call_operand.vmem [shape: s32[2,1,512], index: 1, kind: input, shape index: {}]   ;;  %s1745_s2 = inlined_call_operand.vmem [shape: f32[32,16], index: 2, kind: input, shape index: {}]   ;;  %s1746_s3 = inlined_call_operand.vmem [shape: f32[32,20], index: 3, kind: input, shape index: {}]   ;;  %s1747_s4 = inlined_call_operand.vmem [shape: f32[32,1], index: 4, kind: input, shape index: {}]   ;;  %s1748_s5 = inlined_call_operand.vmem [shape: f32[32,1], index: 5, kind: input, shape index: {}]   ;;  %s1749_s6 = inlined_call_operand.<no memory space> [shape: f32[1], index: 6, kind: input, shape index: {}]   ;;  %s1750_s7 = inlined_call_operand.hbm [shape: f32[2,1,512], index: 7, kind: output, shape index: {}]  }
   0x1   :  { %12 = sst [smem:[#allocation2]] %s1749_s6 }
   0x2   :  { %13 = vsyncpa [#allocation4], 0 }
   0x3   :  { %15 = vsyncpa [#allocation4 + $0x1], 0  ;;  %s1513_s26 = smov 0   ;;  %s1515_s27 = smov 0  }
   0x4   :  { %s1517_s28 = smov 0   ;;  %s1519_s29 = smov 0  }
   0x5 LB: > { %s1534_s6 = sadd.s32 4294967295, %s1463_s29   ;;  %s1155_s30 = sadd.s32 4294967294, %s1463_s29   ;;  %s1463_s29 = sphi %s1519_s29, %s1756_s29   ;;  %s1459_s28 = sphi %s1517_s28, %s1755_s28   ;;  %s1455_s27 = sphi %s1515_s27, %s1754_s27   ;;  %s1451_s26 = sphi %s1513_s26, %s1753_s26  }
   0x6   : > { %s1538_s8 = sadd.s32 1, %s1463_s29   ;;  %s185_s9 = sadd.s32 1, %s1459_s28 }
   0x7   : > { %s182_s10 = ssub.s32 %s1463_s29, %s1538_s8  ;;  %p195_p0 = scmp.ne.s32.totalorder %s1459_s28, %s1455_s27 }
   0x8   : > { %p183_p1 = scmp.eq.s32.totalorder %s182_s10, 0  ;;  %p196_p2 = scmp.eq.s32.totalorder %s1534_s6, 1 }
   0x9   : > { %p201_p3 = scmp.ne.s32.totalorder %s1455_s27, %s1451_s26  ;;  %p202_p4 = scmp.eq.s32.totalorder %s1155_s30, 1 }
   0xa   : > { %s1549_s11 = scalar_select %p183_p1, %s1459_s28, %s185_s9  }
   0xb   : > { %p1551_p5 = por %p196_p2, %p195_p0  ;;  %p1555_p6 = por %p202_p4, %p201_p3 }
   0xc   : > { %p1158_p7 = scmp.ge.s32.totalorder %s1463_s29, 1  ;;  %p249_p8 = scmp.lt.s32.totalorder %s1463_s29, 3 }
   0xe   : > { %p250_p9 = pnand %p1158_p7, %p249_p8 }
   0xf   : > { %p284_p10 = scmp.lt.s32.totalorder (!%p250_p9), %s1534_s6, 1  ;;  %v294_v0 = vlaneseq (!%p250_p9)  ;;  %v1465_v1 = vmov (!%p250_p9), 0.0   ;;  %v1466_v3 = vmov (!%p250_p9), 0   ;;  %v793_v4 = vld [vmem:[%s1747_s4] sm:$0xff] (!%p250_p9)  ;;  %v795_v5 = vld [vmem:[%s1747_s4 + $0x10] sm:$0xff] (!%p250_p9)  ;;  %v794_v11 = vld [vmem:[%s1747_s4 + $0x8] sm:$0xff] (!%p250_p9) }
  0x10   : > { %253 = sbr.rel (%p250_p9) target bundleno = 389 (0x185), region = 48  ;;  %488 = vmatprep.mubr.f32.mxu0 (!%p250_p9), %v1465_v1  ;;  %577 = vmatprep.mubr.f32.mxu1 (!%p250_p9), %v1465_v1  ;;  %v796_v15 = vld [vmem:[%s1747_s4 + $0x18] sm:$0xff] (!%p250_p9)  ;;  %vm411_vm0 = vcmask (!%p250_p9), 1043456   ;;  %v929_v23 = vld [vmem:[%s1748_s5] sm:$0xff] (!%p250_p9)  ;;  %v1467_v24 = vmov (!%p250_p9), 1.0|1.0  }
  0x11   : > { %v1566_v2 = vshrl.u32 (!%p250_p9), %v294_v0, 7  ;;  %1319 = vset.pattern.permute.xlu0 (!%p250_p9), %v1466_v3  ;;  %1320 = vset.pattern.permute.xlu1 (!%p250_p9), %v1466_v3  ;;  %v930_v28 = vld [vmem:[%s1748_s5 + $0x8] sm:$0xff] (!%p250_p9)  ;;  %v931_v29 = vld [vmem:[%s1748_s5 + $0x10] sm:$0xff] (!%p250_p9)  ;;  %v394_v32 = vld [vmem:[%s1746_s3] sm:$0xff] (!%p250_p9)  ;;  %s1005_s24 = sld [smem:[#allocation2]] (!%p250_p9)  ;;  %s1243_s9 = sshll.u32 (!%p250_p9), %s1534_s6, 6 }
  0x12   : > { %799 = vperm.xlu0 (!%p250_p9), %1319, %v793_v4   ;;  %809 = vperm.xlu1 (!%p250_p9), %1320, %v795_v5   ;;  %v395_v33 = vld [vmem:[%s1746_s3 + $0x8] sm:$0xff] (!%p250_p9)  ;;  %v932_v34 = vld [vmem:[%s1748_s5 + $0x18] sm:$0xff] (!%p250_p9)  ;;  %v396_v35 = vld [vmem:[%s1746_s3 + $0x10] sm:$0xff] (!%p250_p9)  ;;  %s1701_s17 = scalar_lea.hbm (!%p250_p9), %s1750_s7, %s1243_s9 }
  0x13   : > { %v303_v6 = vsub.s32 (!%p250_p9), 1, %v1566_v2  ;;  %v311_v7 = vsub.s32 (!%p250_p9), 3, %v1566_v2  ;;  %v299_v8 = vsub.s32 (!%p250_p9), 0, %v1566_v2  ;;  %v1581_v9 = vadd.s32 (!%p250_p9), 8, %v1566_v2  ;;  %v397_v36 = vld [vmem:[%s1746_s3 + $0x18] sm:$0xff] (!%p250_p9)  ;;  %v390_v37 = vld [vmem:[%s1745_s2] sm:$0xff] (!%p250_p9) }
  0x14   : > { %v307_v10 = vsub.s32 (!%p250_p9), 2, %v1566_v2  ;;  %v337_v13 = vadd.s32 (!%p250_p9), 16, %v1566_v2  ;;  %v391_v38 = vld [vmem:[%s1745_s2 + $0x8] sm:$0xff] (!%p250_p9)  ;;  %v392_v39 = vld [vmem:[%s1745_s2 + $0x10] sm:$0xff] (!%p250_p9)  ;;  %v393_v40 = vld [vmem:[%s1745_s2 + $0x18] sm:$0xff] (!%p250_p9) }
  0x16   : > { %804 = vperm.xlu0 (!%p250_p9), %1319, %v794_v11   ;;  %814 = vperm.xlu1 (!%p250_p9), %1320, %v796_v15  }
  0x17   : > { %s285_s14 = scalar_select %p284_p10, %s1534_s6, 1 }
  0x18   : > { %s1469_s6 = smov [#allocation3]  }
  0x19   : > { %s1160_s19 = sshll.u32 %s285_s14, 2  ;;  %s1405_s20 = sshll.u32 %s1469_s6, 4  ;;  %s1406_s20 = int_to_ptr.vmem [resolvable:$false] %s1405_s20 }
  0x1a   : > { %s291_s22 = scalar_lea.vmem %s1744_s1, %s1160_s19  ;;  %s287_s25 = scalar_lea.vmem %s1743_s0, %s1160_s19  ;;  %935 = vperm.xlu0 %1319, %v929_v23   ;;  %940 = vperm.xlu1 %1320, %v930_v28  }
  0x1b   : > { %v293_v12 = vld [vmem:[%s291_s22] sm:$0xf]  ;;  %s1407_s21 = scalar_lea.vmem %s1406_s20, 128 }
  0x1c   : > { %v292_v14 = vld [vmem:[%s287_s25] sm:$0xf]  ;;  %v345_v16 = vrot.slane %v293_v12, %v303_v6  ;;  %v353_v17 = vrot.slane %v293_v12, %v311_v7  ;;  %v341_v18 = vrot.slane %v293_v12, %v299_v8  ;;  %v349_v19 = vrot.slane %v293_v12, %v307_v10  ;;  %s281_s25 = sand.u32 1, %s1455_s27  }
  0x1d   : > { %v304_v20 = vrot.slane %v292_v14, %v303_v6  ;;  %v312_v21 = vrot.slane %v292_v14, %v311_v7  ;;  %v300_v22 = vrot.slane %v292_v14, %v299_v8  ;;  %v308_v25 = vrot.slane %v292_v14, %v307_v10  ;;  %s1159_s30 = sshll.u32 %s281_s25, 2  ;;  %s1070_s18 = scalar_lea.sflag [#allocation4], %s281_s25 }
  0x1e   : > { %vm355_vm1 = vcmp.eq.s32.totalorder %v1566_v2, %v345_v16  ;;  %vm359_vm2 = vcmp.eq.s32.totalorder %v1581_v9, %v345_v16  ;;  %vm357_vm3 = vcmp.eq.s32.totalorder %v1566_v2, %v353_v17  ;;  %vm361_vm4 = vcmp.eq.s32.totalorder %v1581_v9, %v353_v17  ;;  %945 = vperm.xlu0 %1319, %v931_v29   ;;  %s283_s10 = scalar_lea.vmem [#allocation3], %s1159_s30 }
  0x1f   : > { %vm1244_vm5 = vmpackc.low %vm359_vm2, %vm355_vm1  ;;  %vm354_vm6 = vcmp.eq.s32.totalorder %v1566_v2, %v341_v18  ;;  %vm358_vm7 = vcmp.eq.s32.totalorder %v1581_v9, %v341_v18  ;;  %vm356_vm8 = vcmp.eq.s32.totalorder %v1566_v2, %v349_v19  ;;  %vm360_vm9 = vcmp.eq.s32.totalorder %v1581_v9, %v349_v19  ;;  %950 = vperm.xlu1 %1320, %v932_v34   ;;  %s1084_s14 = sshll.u32 %s283_s10, 4  ;;  %s1703_s14 = int_to_ptr.vmem [resolvable:$true] %s1084_s14 }
  0x20   : > { %1245 = vmatprep.subr.msk.bf16.mxu0 %vm1244_vm5, %v1467_v24  ;;  %vm1248_vm10 = vmpackc.low %vm361_vm4, %vm357_vm3  ;;  %vm363_vm11 = vcmp.eq.s32.totalorder %v337_v13, %v345_v16  ;;  %vm365_vm12 = vcmp.eq.s32.totalorder %v337_v13, %v353_v17  ;;  %vm362_vm13 = vcmp.eq.s32.totalorder %v337_v13, %v341_v18  ;;  %vm364_vm15 = vcmp.eq.s32.totalorder %v337_v13, %v349_v19  ;;  %s1401_s19 = scalar_lea.vmem %s1703_s14, 64  ;;  %p1408_p0 = scmp.lt.s32.totalorder %s1703_s14, %s1406_s20 }
  0x21   : > { %1249 = vmatprep.subr.msk.bf16.mxu1 %vm1248_vm10, %v1467_v24  ;;  %vm1246_vm14 = vmpackc.low %vm358_vm7, %vm354_vm6  ;;  %v1179_v26 = vsel %vm363_vm11, 1.0, %v1465_v1  ;;  %v1181_v27 = vsel %vm365_vm12, 1.0, %v1465_v1  ;;  %vm314_vm2 = vcmp.eq.s32.totalorder %v1566_v2, %v304_v20  ;;  %vm318_vm3 = vcmp.eq.s32.totalorder %v1581_v9, %v304_v20  ;;  %p1402_p11 = scmp.ne.s32.totalorder %s1703_s14, %s1401_s19  ;;  %p1409_p1 = scmp.lt.s32.totalorder %s1407_s21, %s1401_s19 }
  0x22   : > { %1247 = vmatpush1.bf16.msk.msra.mxu0 %vm1246_vm14, %v1467_v24  ;;  %vm1250_vm1 = vmpackc.low %vm360_vm9, %vm356_vm8  ;;  %vm316_vm4 = vcmp.eq.s32.totalorder %v1566_v2, %v312_v21  ;;  %vm320_vm5 = vcmp.eq.s32.totalorder %v1581_v9, %v312_v21  ;;  %v1178_v30 = vsel %vm362_vm13, 1.0, %v1465_v1  ;;  %vm313_vm6 = vcmp.eq.s32.totalorder %v1566_v2, %v300_v22 }
  0x23   : > { %1251 = vmatpush1.bf16.msk.msra.mxu1 %vm1250_vm1, %v1467_v24  ;;  %1186 = vmatprep.subr.msk.mxu0 %vm411_vm0, %v1179_v26  ;;  %vm317_vm7 = vcmp.eq.s32.totalorder %v1581_v9, %v300_v22  ;;  %v1180_v31 = vsel %vm364_vm15, 1.0, %v1465_v1  ;;  %vm398_vm8 = vcmask 162816   ;;  %vm1252_vm9 = vmpackc.low %vm318_vm3, %vm314_vm2  ;;  %vm315_vm10 = vcmp.eq.s32.totalorder %v1566_v2, %v308_v25  ;;  %p1403_p12 = pnand %p1402_p11, %p1551_p5  ;;  %p1410_p2 = por %p1409_p1, %p1408_p0 }
  0x24   : > { %1196 = vmatprep.subr.msk.mxu1 %vm411_vm0, %v1181_v27  ;;  %vm319_vm11 = vcmp.eq.s32.totalorder %v1581_v9, %v308_v25  ;;  %vm1256_vm12 = vmpackc.low %vm320_vm5, %vm316_vm4  ;;  %vm1066_vm15 = vcmp.lt.s32.totalorder %v294_v0, 512 }
  0x25   : > { %vm1254_vm13 = vmpackc.low %vm317_vm7, %vm313_vm6  ;;  %p1404_p13 = pneg %p1403_p12 }
  0x26   : > { %1187 = vmatpush1.msk.msra.mxu0 %vm411_vm0, %v1178_v30  ;;  %vm1258_vm14 = vmpackc.low %vm319_vm11, %vm315_vm10 }
  0x27   : > { %1197 = vmatpush1.msk.msra.mxu1 %vm411_vm0, %v1180_v31  ;;  %1188 = vmatmul.mubr.msk.f32.vlgmr.msra.gmra.mrb[0].mxu0 %vm398_vm8, %v394_v32  ;;  %vm602_vm0 = vcmask 130048   ;;  %p1411_p3 = pnand %p1410_p2, %p1404_p13 }
  0x28   : > { %1198 = vmatmul.mubr.msk.f32.vlgmr.msra.gmra.mrb[0].mxu1 %vm398_vm8, %v394_v32  ;;  %1253 = vmatprep.subr.msk.bf16.mxu0 %vm1252_vm9, %v1467_v24 }
  0x29   : > { %1257 = vmatprep.subr.msk.bf16.mxu1 %vm1256_vm12, %v1467_v24  ;;  %1255 = vmatpush1.bf16.msk.msra.mxu0 %vm1254_vm13, %v1467_v24 }
  0x2a   : > { %1259 = vmatpush1.bf16.msk.msra.mxu1 %vm1258_vm14, %v1467_v24  ;;  %494 = vmatprep.mubr.f32.mxu0 %v1465_v1 }
  0x2b   : > { %583 = vmatprep.mubr.f32.mxu1 %v1465_v1  ;;  %1189 = vmatmul.mubr.msk.f32.gmra.mrb[2].mxu0 %vm398_vm8, %v395_v33 }
  0x2c   : > { %1199 = vmatmul.mubr.msk.f32.gmra.mrb[2].mxu1 %vm398_vm8, %v395_v33  ;;  %500 = vmatprep.mubr.f32.mxu0 %v1465_v1 }
  0x2d   : > { %589 = vmatprep.mubr.f32.mxu1 %v1465_v1 }
  0x2f   : > { %1190 = vmatmul.mubr.msk.f32.gmra.mrb[4].mxu0 %vm398_vm8, %v396_v35 }
  0x30   : > { %1200 = vmatmul.mubr.msk.f32.gmra.mrb[4].mxu1 %vm398_vm8, %v396_v35  ;;  %506 = vmatprep.mubr.f32.mxu0 %v1465_v1 }
  0x31   : > { %595 = vmatprep.mubr.f32.mxu1 %v1465_v1 }
  0x33   : > { %1191 = vmatmul.mubr.msk.f32.gmra.mrb[6].mxu0 %vm398_vm8, %v397_v36 }
  0x34   : > { %1201 = vmatmul.mubr.msk.f32.gmra.mrb[6].mxu1 %vm398_vm8, %v397_v36  ;;  %679 = vmatprep.mubr.f32.mxu0 %v1465_v1 }
  0x35   : > { %768 = vmatprep.mubr.f32.mxu1 %v1465_v1 }
  0x37   : > { %1206 = vmatmul.mubr.msk.f32.vlgmr.msra.gmra.mrb[0].mxu0 %vm602_vm0, %v390_v37 }
  0x38   : > { %1214 = vmatmul.mubr.msk.f32.vlgmr.msra.gmra.mrb[0].mxu1 %vm602_vm0, %v390_v37  ;;  %685 = vmatprep.mubr.f32.mxu0 %v1465_v1 }
  0x39   : > { %774 = vmatprep.mubr.f32.mxu1 %v1465_v1 }
  0x3b   : > { %1207 = vmatmul.mubr.msk.f32.gmra.mrb[2].mxu0 %vm602_vm0, %v391_v38 }
  0x3c   : > { %1215 = vmatmul.mubr.msk.f32.gmra.mrb[2].mxu1 %vm602_vm0, %v391_v38  ;;  %691 = vmatprep.mubr.f32.mxu0 %v1465_v1 }
  0x3d   : > { %780 = vmatprep.mubr.f32.mxu1 %v1465_v1 }
  0x3f   : > { %1208 = vmatmul.mubr.msk.f32.gmra.mrb[4].mxu0 %vm602_vm0, %v392_v39 }
  0x40   : > { %1216 = vmatmul.mubr.msk.f32.gmra.mrb[4].mxu1 %vm602_vm0, %v392_v39  ;;  %697 = vmatprep.mubr.f32.mxu0 %v1465_v1 }
  0x41   : > { %786 = vmatprep.mubr.f32.mxu1 %v1465_v1 }
  0x43   : > { %1209 = vmatmul.mubr.msk.f32.gmra.mrb[6].mxu0 %vm602_vm0, %v393_v40 }
  0x44   : > { %1217 = vmatmul.mubr.msk.f32.gmra.mrb[6].mxu1 %vm602_vm0, %v393_v40 }
  0x91   : > { %v800_v41 = vpop.permute.xlu0 %799  ;;  %v810_v59 = vpop.permute.xlu1 %809 }
  0x95   : > { %v805_v51 = vpop.permute.xlu0 %804  ;;  %v815_v15 = vpop.permute.xlu1 %814 }
 0x10a   : > { %v681_v42 = vpop.f32.mrb[0].mxu0 }
 0x10b   : > { %v817_v43 = vadd.f32 %v800_v41, %v681_v42  ;;  %v770_v44 = vpop.f32.mrb[0].mxu1  ;;  %v683_v45 = vpop.f32.mrb[1].mxu0 }
 0x10c   : > { %v819_v46 = vadd.f32 %v800_v41, %v770_v44  ;;  %v818_v47 = vadd.f32 %v800_v41, %v683_v45  ;;  %v772_v48 = vpop.f32.mrb[1].mxu1 }
 0x10d   : > { %v1218_v49 = vmul.f32 -1.442695, %v817_v43  ;;  %v820_v50 = vadd.f32 %v800_v41, %v772_v48 }
 0x10e   : > { %v1220_v52 = vmul.f32 -1.442695, %v819_v46  ;;  %v1219_v53 = vmul.f32 -1.442695, %v818_v47  ;;  %v687_v54 = vpop.f32.mrb[2].mxu0 }
 0x10f   : > { %1321 = vpow2.f32 %v1218_v49  ;;  %v1221_v55 = vmul.f32 -1.442695, %v820_v50  ;;  %v821_v56 = vadd.f32 %v805_v51, %v687_v54  ;;  %v776_v57 = vpop.f32.mrb[2].mxu1  ;;  %v689_v58 = vpop.f32.mrb[3].mxu0 }
 0x110   : > { %1323 = vpow2.f32 %v1220_v52  ;;  %v823_v60 = vadd.f32 %v805_v51, %v776_v57  ;;  %v822_v61 = vadd.f32 %v805_v51, %v689_v58  ;;  %v778_v62 = vpop.f32.mrb[3].mxu1 }
 0x111   : > { %1325 = vpow2.f32 %v1219_v53  ;;  %v1222_v63 = vmul.f32 -1.442695, %v821_v56  ;;  %v824_v1 = vadd.f32 %v805_v51, %v778_v62 }
 0x112   : > { %1327 = vpow2.f32 %v1221_v55  ;;  %v1224_v3 = vmul.f32 -1.442695, %v823_v60  ;;  %v1223_v4 = vmul.f32 -1.442695, %v822_v61  ;;  %v693_v5 = vpop.f32.mrb[4].mxu0  ;;  %v936_v60 = vpop.permute.xlu0 %935 }
 0x113   : > { %1329 = vpow2.f32 %v1222_v63  ;;  %v1225_v6 = vmul.f32 -1.442695, %v824_v1  ;;  %v825_v7 = vadd.f32 %v810_v59, %v693_v5  ;;  %v782_v8 = vpop.f32.mrb[4].mxu1  ;;  %v695_v9 = vpop.f32.mrb[5].mxu0 }
 0x114   : > { %1331 = vpow2.f32 %v1224_v3  ;;  %v827_v10 = vadd.f32 %v810_v59, %v782_v8  ;;  %v826_v11 = vadd.f32 %v810_v59, %v695_v9  ;;  %v784_v12 = vpop.f32.mrb[5].mxu1  ;;  %v941_v63 = vpop.permute.xlu1 %940 }
 0x115   : > { %1333 = vpow2.f32 %v1223_v4  ;;  %v1226_v13 = vmul.f32 -1.442695, %v825_v7  ;;  %v828_v14 = vadd.f32 %v810_v59, %v784_v12 }
 0x116   : > { %1335 = vpow2.f32 %v1225_v6  ;;  %v1228_v16 = vmul.f32 -1.442695, %v827_v10  ;;  %v1227_v17 = vmul.f32 -1.442695, %v826_v11  ;;  %v699_v18 = vpop.f32.mrb[6].mxu0 }
 0x117   : > { %1337 = vpow2.f32 %v1226_v13  ;;  %v1229_v19 = vmul.f32 -1.442695, %v828_v14  ;;  %v829_v20 = vadd.f32 %v815_v15, %v699_v18  ;;  %v788_v21 = vpop.f32.mrb[6].mxu1  ;;  %v701_v22 = vpop.f32.mrb[7].mxu0 }
 0x118   : > { %1339 = vpow2.f32 %v1228_v16  ;;  %v790_v23 = vpop.f32.mrb[7].mxu1  ;;  %v831_v42 = vadd.f32 %v815_v15, %v788_v21  ;;  %v830_v45 = vadd.f32 %v815_v15, %v701_v22  ;;  %v946_v16 = vpop.permute.xlu0 %945 }
 0x119   : > { %v1322_v24 = vpop.eup %1321  ;;  %1341 = vpow2.f32 %v1227_v17  ;;  %v1230_v25 = vmul.f32 -1.442695, %v829_v20  ;;  %v832_v48 = vadd.f32 %v815_v15, %v790_v23 }
 0x11a   : > { %v1324_v26 = vpop.eup %1323  ;;  %v881_v27 = vadd.f32 1.0, %v1322_v24  ;;  %1343 = vpow2.f32 %v1229_v19  ;;  %v1232_v53 = vmul.f32 -1.442695, %v831_v42  ;;  %v1231_v56 = vmul.f32 -1.442695, %v830_v45 }
 0x11b   : > { %v1326_v28 = vpop.eup %1325  ;;  %v883_v29 = vadd.f32 1.0, %v1324_v26  ;;  %1345 = vpow2.f32 %v1230_v25  ;;  %v1233_v58 = vmul.f32 -1.442695, %v832_v48 }
 0x11c   : > { %v1328_v30 = vpop.eup %1327  ;;  %1347 = vrcp.f32 %v881_v27  ;;  %v882_v31 = vadd.f32 1.0, %v1326_v28 }
 0x11d   : > { %v1330_v32 = vpop.eup %1329  ;;  %1349 = vrcp.f32 %v883_v29  ;;  %v884_v33 = vadd.f32 1.0, %v1328_v30  ;;  %v951_v29 = vpop.permute.xlu1 %950 }
 0x11e   : > { %v1332_v34 = vpop.eup %1331  ;;  %1351 = vrcp.f32 %v882_v31  ;;  %v885_v35 = vadd.f32 1.0, %v1330_v32 }
 0x11f   : > { %v1334_v36 = vpop.eup %1333  ;;  %1353 = vrcp.f32 %v884_v33  ;;  %v887_v37 = vadd.f32 1.0, %v1332_v34 }
 0x120   : > { %v1336_v38 = vpop.eup %1335  ;;  %1355 = vrcp.f32 %v885_v35  ;;  %v886_v39 = vadd.f32 1.0, %v1334_v36 }
 0x121   : > { %v1338_v40 = vpop.eup %1337  ;;  %1357 = vrcp.f32 %v887_v37  ;;  %v888_v41 = vadd.f32 1.0, %v1336_v38 }
 0x122   : > { %v1340_v43 = vpop.eup %1339  ;;  %1359 = vrcp.f32 %v886_v39  ;;  %v889_v44 = vadd.f32 1.0, %v1338_v40 }
 0x123   : > { %v1342_v46 = vpop.eup %1341  ;;  %1361 = vrcp.f32 %v888_v41  ;;  %v891_v47 = vadd.f32 1.0, %v1340_v43 }
 0x124   : > { %v1344_v49 = vpop.eup %1343  ;;  %1363 = vrcp.f32 %v889_v44  ;;  %v890_v50 = vadd.f32 1.0, %v1342_v46 }
 0x125   : > { %v1346_v51 = vpop.eup %1345  ;;  %1365 = vrcp.f32 %v891_v47  ;;  %v892_v52 = vadd.f32 1.0, %v1344_v49 }
 0x126   : > { %v1348_v54 = vpop.eup %1347  ;;  %1367 = vrcp.f32 %v890_v50  ;;  %v893_v55 = vadd.f32 1.0, %v1346_v51 }
 0x127   : > { %v1350_v57 = vpop.eup %1349  ;;  %1369 = vrcp.f32 %v892_v52  ;;  %v953_v3 = vmul.f32 %v1348_v54, %v936_v60  ;;  %v1006_v54 = vstv %s1005_s24 }
 0x128   : > { %v1352_v59 = vpop.eup %1351  ;;  %1371 = vrcp.f32 %v893_v55  ;;  %v955_v6 = vmul.f32 %v1350_v57, %v936_v60 }
 0x129   : > { %v1354_v61 = vpop.eup %1353  ;;  %1373 = vpow2.f32 %v1232_v53  ;;  %v954_v9 = vmul.f32 %v1352_v59, %v936_v60 }
 0x12a   : > { %v1356_v62 = vpop.eup %1355  ;;  %1375 = vpow2.f32 %v1231_v56  ;;  %v956_v13 = vmul.f32 %v1354_v61, %v936_v60 }
 0x12b   : > { %v1358_v1 = vpop.eup %1357  ;;  %v957_v4 = vmul.f32 %v1356_v62, %v941_v63  ;;  %1377 = vpow2.f32 %v1233_v58 }
 0x12c   : > { %v1360_v5 = vpop.eup %1359  ;;  %v959_v7 = vmul.f32 %v1358_v1, %v941_v63 }
 0x12d   : > { %v1362_v8 = vpop.eup %1361  ;;  %v958_v10 = vmul.f32 %v1360_v5, %v941_v63  ;;  %v969_v11 = vadd.f32 %v957_v4, %v953_v3 }
 0x12e   : > { %v1364_v12 = vpop.eup %1363  ;;  %v960_v14 = vmul.f32 %v1362_v8, %v941_v63  ;;  %v987_v15 = vadd.f32 %v959_v7, %v955_v6 }
 0x12f   : > { %v1366_v17 = vpop.eup %1365  ;;  %v978_v18 = vadd.f32 %v958_v10, %v954_v9  ;;  %v961_v19 = vmul.f32 %v1364_v12, %v946_v16 }
 0x130   : > { %v1368_v20 = vpop.eup %1367  ;;  %v996_v21 = vadd.f32 %v960_v14, %v956_v13  ;;  %v963_v22 = vmul.f32 %v1366_v17, %v946_v16 }
 0x131   : > { %v1370_v23 = vpop.eup %1369  ;;  %v970_v24 = vadd.f32 %v969_v11, %v961_v19  ;;  %v962_v25 = vmul.f32 %v1368_v20, %v946_v16 }
 0x132   : > { %v1372_v26 = vpop.eup %1371  ;;  %v988_v27 = vadd.f32 %v987_v15, %v963_v22  ;;  %v964_v28 = vmul.f32 %v1370_v23, %v946_v16 }
 0x133   : > { %v1374_v30 = vpop.eup %1373  ;;  %v979_v31 = vadd.f32 %v978_v18, %v962_v25  ;;  %v965_v32 = vmul.f32 %v1372_v26, %v951_v29 }
 0x134   : > { %v1376_v33 = vpop.eup %1375  ;;  %v997_v34 = vadd.f32 %v996_v21, %v964_v28  ;;  %v895_v35 = vadd.f32 1.0, %v1374_v30  ;;  %v1468_v28 = vmov 1966171168  }
 0x135   : > { %v1378_v36 = vpop.eup %1377  ;;  %v971_v37 = vadd.f32 %v970_v24, %v965_v32  ;;  %v894_v38 = vadd.f32 1.0, %v1376_v33 }
 0x136   : > { %1379 = vrcp.f32 %v895_v35  ;;  %v896_v39 = vadd.f32 1.0, %v1378_v36 }
 0x137   : > { %v972_v40 = vrot.slane %v971_v37, 4  ;;  %1381 = vrcp.f32 %v894_v38 }
 0x138   : > { %1383 = vrcp.f32 %v896_v39 }
 0x139   : > { %v973_v41 = vadd.f32 %v972_v40, %v971_v37 }
 0x13b   : > { %v974_v42 = vrot.slane %v973_v41, 2 }
 0x13d   : > { %v975_v43 = vadd.f32 %v974_v42, %v973_v41 }
 0x13f   : > { %v976_v45 = vrot.slane %v975_v43, 1 }
 0x140   : > { %v1380_v44 = vpop.eup %1379 }
 0x141   : > { %v1382_v46 = vpop.eup %1381  ;;  %v967_v47 = vmul.f32 %v1380_v44, %v951_v29  ;;  %v977_v52 = vadd.f32 %v976_v45, %v975_v43 }
 0x142   : > { %v1384_v48 = vpop.eup %1383  ;;  %v966_v49 = vmul.f32 %v1382_v46, %v951_v29 }
 0x143   : > { %v989_v50 = vadd.f32 %v988_v27, %v967_v47  ;;  %v968_v51 = vmul.f32 %v1384_v48, %v951_v29  ;;  %v1007_v60 = vadd.f32 %v1006_v54, %v977_v52  ;;  %v1042_v29 = vunpack.c.l.s4 %v1468_v28 }
 0x144   : > { %v980_v53 = vadd.f32 %v979_v31, %v966_v49 }
 0x145   : > { %v990_v55 = vrot.slane %v989_v50, 4  ;;  %v998_v56 = vadd.f32 %v997_v34, %v968_v51  ;;  %v1234_v5 = vmul.f32 -1.442695, %v1007_v60  ;;  %v1043_v30 = vunpack.c.0.s8 %v1042_v29 }
 0x146   : > { %v981_v57 = vrot.slane %v980_v53, 4 }
 0x147   : > { %v991_v58 = vadd.f32 %v990_v55, %v989_v50  ;;  %v999_v59 = vrot.slane %v998_v56, 4  ;;  %1385 = vpow2.f32 %v1234_v5  ;;  %v1046_v33 = vsub.s32 %v1043_v30, %v1566_v2 }
 0x148   : > { %v982_v61 = vadd.f32 %v981_v57, %v980_v53 }
 0x149   : > { %v992_v62 = vrot.slane %v991_v58, 2  ;;  %v1000_v63 = vadd.f32 %v999_v59, %v998_v56 }
 0x14a   : > { %v983_v1 = vrot.slane %v982_v61, 2 }
 0x14b   : > { %v993_v3 = vadd.f32 %v992_v62, %v991_v58  ;;  %v1001_v4 = vrot.slane %v1000_v63, 2 }
 0x14c   : > { %v984_v6 = vadd.f32 %v983_v1, %v982_v61 }
 0x14d   : > { %v994_v7 = vrot.slane %v993_v3, 1  ;;  %v1002_v8 = vadd.f32 %v1001_v4, %v1000_v63 }
 0x14e   : > { %v985_v9 = vrot.slane %v984_v6, 1 }
 0x14f   : > { %v995_v10 = vadd.f32 %v994_v7, %v993_v3  ;;  %v1003_v11 = vrot.slane %v1002_v8, 1 }
 0x150   : > { %v986_v12 = vadd.f32 %v985_v9, %v984_v6 }
 0x151   : > { %v1009_v13 = vadd.f32 %v1006_v54, %v995_v10  ;;  %v1004_v14 = vadd.f32 %v1003_v11, %v1002_v8  ;;  %v1386_v20 = vpop.eup %1385 }
 0x152   : > { %v1008_v15 = vadd.f32 %v1006_v54, %v986_v12  ;;  %v1023_v21 = vadd.f32 1.0, %v1386_v20 }
 0x153   : > { %v1236_v16 = vmul.f32 -1.442695, %v1009_v13  ;;  %v1010_v17 = vadd.f32 %v1006_v54, %v1004_v14 }
 0x154   : > { %v1235_v18 = vmul.f32 -1.442695, %v1008_v15 }
 0x155   : > { %1387 = vpow2.f32 %v1236_v16  ;;  %v1237_v19 = vmul.f32 -1.442695, %v1010_v17 }
 0x156   : > { %1389 = vpow2.f32 %v1235_v18 }
 0x157   : > { %1391 = vpow2.f32 %v1237_v19 }
 0x158   : > { %1393 = vrcp.f32 %v1023_v21 }
 0x15f   : > { %v1388_v22 = vpop.eup %1387 }
 0x160   : > { %v1390_v23 = vpop.eup %1389  ;;  %v1025_v24 = vadd.f32 1.0, %v1388_v22 }
 0x161   : > { %v1392_v25 = vpop.eup %1391  ;;  %v1024_v26 = vadd.f32 1.0, %v1390_v23 }
 0x162   : > { %v1026_v27 = vadd.f32 1.0, %v1392_v25  ;;  %1395 = vrcp.f32 %v1025_v24  ;;  %v1394_v31 = vpop.eup %1393 }
 0x163   : > { %1397 = vrcp.f32 %v1024_v26 }
 0x164   : > { %1399 = vrcp.f32 %v1026_v27 }
 0x16c   : > { %v1396_v32 = vpop.eup %1395 }
 0x16d   : > { %v1398_v34 = vpop.eup %1397 }
 0x16e   : > { %v1400_v35 = vpop.eup %1399  ;;  %v1039_v36 = vcombine.low %v1394_v31, %v1398_v34 }
 0x16f   : > { %v1040_v37 = vcombine.low %v1396_v32, %v1400_v35 }
 0x170   : > { %v1047_v38 = vrot.slane %v1039_v36, %v1046_v33 }
 0x171   : > { %v1054_v39 = vrot.slane %v1040_v37, %v1046_v33 }
 0x173   : > { %v1055_v40 = vcombine.low %v1047_v38, %v1054_v39 }
 0x175   : > { %v1062_v41 = vrot.slane %v1055_v40, %v1046_v33 }
 0x177   : > { %1068 = vst.msk [vmem:[%s283_s10] sm:$0xf] %vm1066_vm15, %v1062_v41 }
 0x178   : > { %1414 = shalt.err (!%p1411_p3)
}
 0x179   : > { %s1415_s22 = scalar_lea.hbm %s1701_s17, 64  ;;  %s1419_s25 = scalar_lea.hbm %s1750_s7, 128 }
 0x17a   : > { %p1416_p4 = scmp.ne.s32.totalorder %s1701_s17, %s1415_s22  ;;  %p1420_p9 = scmp.lt.u32.totalorder %s1701_s17, %s1750_s7 }
 0x17b   : > { %p1421_p10 = scmp.lt.u32.totalorder %s1419_s25, %s1415_s22  ;;  %p1423_p12 = scmp.lt.u32.totalorder %s1415_s22, %s1701_s17 }
 0x17c   : > { %p1417_p7 = pnand %p1416_p4, %p1551_p5 }
 0x17d   : > { %p1422_p11 = por %p1421_p10, %p1420_p9 }
 0x17e   : > { %p1418_p8 = pneg %p1417_p7 }
 0x17f   : > { %p1424_p13 = por %p1423_p12, %p1422_p11 }
 0x181   : > { %p1425_p0 = pnand %p1424_p13, %p1418_p8 }
 0x183   : > { %1428 = shalt.err (!%p1425_p0)
}
 0x184   : > { %1276 = dma.vmem_to_hbm [thread:$0]  (%p1551_p5), %s1703_s14, 64, %s1701_s17, %s1070_s18  }
 0x185 PF: > { %p1282_p1 = scmp.ge.s32.totalorder %s1463_s29, 2  ;;  %s1096_s10 = sand.u32 1, %s1451_s26  }
 0x186   : > { %s1097_s15 = scalar_lea.sflag [#allocation4], %s1096_s10 }
 0x187   : > { %p1279_p2 = pnand %p1282_p1, %p1555_p6 }
 0x189   : > { %1446 = dma.done.wait (!%p1279_p2), %s1097_s15, 64  }
 0x18a   : > { %1448 = vsyncadd (!%p1279_p2), %s1097_s15, 4294967232  ;;  %p18_p3 = scmp.ge.s32.totalorder %s1538_s8, 4   ;;  %s1753_s26 = smov %s1455_s27 }
 0x18b   : > { %s1754_s27 = smov %s1459_s28  ;;  %s1755_s28 = smov %s1549_s11 }
 0x18c   : > { %s1756_s29 = smov %s1538_s8  ;;  %20 = sbr.rel (!%p18_p3) target bundleno = 5 (0x5), region = 86 }
 0x193   :  { %1102 = vsyncpa [#allocation4], 1 }
 0x194   :  { %1104 = vsyncpa [#allocation4 + $0x1], 1 }

</bundles_post_ra>
